<compile_context>
chip_gen: v7x
topology: tpu7x:2x2x1
jax: 0.10.0
libtpu: 0.0.40
codegen_flags: <defaults>
</compile_context>

<pallas_src>
import functools

import jax
import jax.numpy as jnp
from jax.experimental import pallas as pl
from jax.experimental.pallas import tpu as pltpu


def _attn_math(q, k, v, mask, keep, *, dropout_p, out_dtype, attn_dtype):
    """q: (bt, tq, Dk) pre-scaled by 1/temper; k,v: (bt, Lk, Dk);
    mask/keep: (bt, tq, Lk) int8 (mask: 1 == masked; keep: 1 == keep)."""
    # scores = (q / temper) @ k^T  -- contraction on the last dim of both
    # operands => no materialised transpose of k.
    s = jnp.einsum("bqd,bkd->bqk", q, k, preferred_element_type=jnp.float32)

    # masked_fill_(attn_mask, -inf); fully masked rows NaN exactly like torch.
    s = jnp.where(mask != 0, -jnp.inf, s)

    # softmax along the last axis (f32)
    m = jnp.max(s, axis=-1, keepdims=True)
    e = jnp.exp(s - m)
    denom = jnp.sum(e, axis=-1, keepdims=True)
    attn = e * (1.0 / denom)

    # inverted dropout (nn.Dropout train-mode semantics); scale stays exact f32
    if keep is not None and dropout_p > 0.0:
        attn = attn * (keep.astype(jnp.float32) * (1.0 / (1.0 - dropout_p)))

    # output = attn @ v (attn cast to the MXU compute dtype, f32 accumulation)
    out = jnp.einsum("bqk,bkd->bqd", attn.astype(v.dtype), v,
                     preferred_element_type=jnp.float32)
    return out.astype(out_dtype), attn.astype(attn_dtype)


def _sdpa_kernel(q_ref, k_ref, v_ref, mask_ref, out_ref, attn_ref):
    out, attn = _attn_math(q_ref[...], k_ref[...], v_ref[...], mask_ref[...],
                           None, dropout_p=0.0,
                           out_dtype=out_ref.dtype, attn_dtype=attn_ref.dtype)
    out_ref[...] = out
    attn_ref[...] = attn


def _sdpa_dropout_kernel(q_ref, k_ref, v_ref, mask_ref, keep_ref,
                         out_ref, attn_ref, *, dropout_p):
    out, attn = _attn_math(q_ref[...], k_ref[...], v_ref[...], mask_ref[...],
                           keep_ref[...], dropout_p=dropout_p,
                           out_dtype=out_ref.dtype, attn_dtype=attn_ref.dtype)
    out_ref[...] = out
    attn_ref[...] = attn


def _pick_block(dim, cap, multiple):
    """Largest divisor of `dim` that is <= cap and a multiple of `multiple`;
    falls back to the full dim (full-extent blocks are always layout-legal)."""
    if dim <= cap:
        return dim
    best = None
    for d in range(multiple, cap + 1, multiple):
        if dim % d == 0:
            best = d
    return best if best is not None else dim


def scaled_dot_product_attention(q, k, v, attn_mask, *, d_model,
                                 attn_dropout=0.1, dropout_rng=None,
                                 compute_dtype=jnp.bfloat16,
                                 out_dtype=jnp.float32,
                                 attn_dtype=jnp.float32,
                                 block_b=8, block_q=256):
    """q/k/v: (B, L, Dk) f32 with B = n_head*batch; attn_mask: (B, Lq, Lk),
    nonzero == masked.  Returns (output, attn) like the PyTorch module
    (attn is post-dropout).  NOTE: scale is sqrt(d_model), not sqrt(d_k),
    matching the source module."""
    B, Lq, Dk = q.shape
    _, Lk, _ = k.shape
    assert k.shape == (B, Lk, Dk) and v.shape == (B, Lk, Dk)
    assert attn_mask.shape == (B, Lq, Lk)

    temper = float(d_model) ** 0.5
    # Fold 1/temper into q once; cast MXU operands to the compute dtype.
    q_in = (q.astype(jnp.float32) * (1.0 / temper)).astype(compute_dtype)
    k_in = k.astype(compute_dtype)
    v_in = v.astype(compute_dtype)
    mask_in = (attn_mask != 0).astype(jnp.int8)   # 4x less HBM traffic vs int32

    bt = _pick_block(B, block_b, 1)
    tq = _pick_block(Lq, block_q, 32)   # 32 keeps f32/bf16/int8 sublane tiling legal
    grid = (B // bt, Lq // tq)

    dropout_p = float(attn_dropout)
    has_dropout = dropout_p > 0.0

    in_specs = [
        pl.BlockSpec((bt, tq, Dk), lambda b, i: (b, i, 0)),   # q
        pl.BlockSpec((bt, Lk, Dk), lambda b, i: (b, 0, 0)),   # k
        pl.BlockSpec((bt, Lk, Dk), lambda b, i: (b, 0, 0)),   # v
        pl.BlockSpec((bt, tq, Lk), lambda b, i: (b, i, 0)),   # mask
    ]
    inputs = [q_in, k_in, v_in, mask_in]

    if has_dropout:
        if dropout_rng is None:
            dropout_rng = jax.random.PRNGKey(0)
        # Keep-mask drawn with the portable JAX PRNG (the TPU hardware PRNG
        # has no interpret/CPU lowering); int8 to minimise DMA traffic.
        keep = jax.random.bernoulli(
            dropout_rng, 1.0 - dropout_p, (B, Lq, Lk)).astype(jnp.int8)
        in_specs.append(pl.BlockSpec((bt, tq, Lk), lambda b, i: (b, i, 0)))
        inputs.append(keep)
        kernel = functools.partial(_sdpa_dropout_kernel, dropout_p=dropout_p)
    else:
        kernel = _sdpa_kernel

    out_specs = [
        pl.BlockSpec((bt, tq, Dk), lambda b, i: (b, i, 0)),
        pl.BlockSpec((bt, tq, Lk), lambda b, i: (b, i, 0)),
    ]
    out_shapes = (
        jax.ShapeDtypeStruct((B, Lq, Dk), out_dtype),
        jax.ShapeDtypeStruct((B, Lq, Lk), attn_dtype),
    )

    # Advisory cost estimate so XLA schedules this custom call sensibly.
    flops = 4 * B * Lq * Lk * Dk                  # two batched matmuls
    transcendentals = B * Lq * Lk                 # softmax exp
    bytes_accessed = int(
        q_in.size * q_in.dtype.itemsize
        + k_in.size * k_in.dtype.itemsize
        + v_in.size * v_in.dtype.itemsize
        + mask_in.size
        + (inputs[-1].size if has_dropout else 0)
        + B * Lq * Dk * jnp.dtype(out_dtype).itemsize
        + B * Lq * Lk * jnp.dtype(attn_dtype).itemsize)

    grid_spec = pltpu.PrefetchScalarGridSpec(
        num_scalar_prefetch=0,
        grid=grid,
        in_specs=in_specs,
        out_specs=out_specs,
    )

    return pl.pallas_call(
        kernel,
        out_shape=out_shapes,
        grid_spec=grid_spec,
        compiler_params=pltpu.CompilerParams(
            # No cross-step state -> both grid axes shardable across
            # TensorCores (v7x megacore); neutral on v5e/v6e.
            dimension_semantics=("parallel", "parallel"),
            # Explicit scoped-VMEM limit, safe on v5e/v6e/v7x and above the
            # v5e default of 16 MiB.
            vmem_limit_bytes=32 * 1024 * 1024,
        ),
        cost_estimate=pl.CostEstimate(
            flops=flops,
            transcendentals=transcendentals,
            bytes_accessed=bytes_accessed),
    )(*inputs)


def _reference_no_dropout(q, k, v, attn_mask, d_model):
    temper = float(d_model) ** 0.5
    scores = jnp.einsum("bqd,bkd->bqk", q, k,
                        precision=jax.lax.Precision.HIGHEST) / temper
    scores = jnp.where(attn_mask != 0, -jnp.inf, scores)
    attn = jax.nn.softmax(scores, axis=-1)
    out = jnp.einsum("bqk,bkd->bqd", attn, v,
                     precision=jax.lax.Precision.HIGHEST)
    return out, attn


if __name__ == "__main__":
    # Toy shapes implied by the Encoder: batch=2, max_length=8, d_model=32,
    # n_head=2 -> d_k=16; SDPA operands are (n_head*batch, len, d_k) = (4,8,16).
    batch, n_head, L, d_model = 2, 2, 8, 32
    d_k = d_model // n_head
    B = n_head * batch

    key = jax.random.PRNGKey(0)
    kq, kk, kv, kd = jax.random.split(key, 4)
    q = jax.random.normal(kq, (B, L, d_k), dtype=jnp.float32)
    k = jax.random.normal(kk, (B, L, d_k), dtype=jnp.float32)
    v = jax.random.normal(kv, (B, L, d_k), dtype=jnp.float32)

    # Padding mask exactly like get_attn_padding_mask (PAD == 0), repeated
    # over heads like MultiHeadAttention does (attn_mask.repeat(n_head,1,1)).
    src_seq = jnp.array([[5, 3, 7, 2, 9, 0, 0, 0],
                         [4, 6, 1, 8, 2, 7, 0, 0]], dtype=jnp.int32)
    pad_mask = (src_seq == 0)[:, None, :]                       # (batch,1,Lk)
    pad_mask = jnp.broadcast_to(pad_mask, (batch, L, L))        # (batch,Lq,Lk)
    attn_mask = jnp.tile(pad_mask, (n_head, 1, 1)).astype(jnp.int32)

    # 1) correctness check: f32 compute path, dropout disabled.
    out_f32, attn_f32 = scaled_dot_product_attention(
        q, k, v, attn_mask, d_model=d_model, attn_dropout=0.0,
        compute_dtype=jnp.float32)
    jax.block_until_ready((out_f32, attn_f32))
    ref_out, ref_attn = _reference_no_dropout(q, k, v, attn_mask, d_model)
    assert jnp.allclose(out_f32, ref_out, atol=2e-2, rtol=2e-2)
    assert jnp.allclose(attn_f32, ref_attn, atol=2e-2, rtol=2e-2)

    # 2) default fast path: bf16 MXU operands, f32 softmax/accumulation.
    out_bf, attn_bf = scaled_dot_product_attention(
        q, k, v, attn_mask, d_model=d_model, attn_dropout=0.0)
    jax.block_until_ready((out_bf, attn_bf))
    assert jnp.allclose(out_bf, ref_out, atol=5e-2, rtol=5e-2)
    assert jnp.allclose(attn_bf, ref_attn, atol=5e-2, rtol=5e-2)

    # 3) train-mode run with the module default attn_dropout=0.1.
    out_d, attn_d = scaled_dot_product_attention(
        q, k, v, attn_mask, d_model=d_model, attn_dropout=0.1, dropout_rng=kd)
    jax.block_until_ready((out_d, attn_d))
    assert out_d.shape == (B, L, d_k) and attn_d.shape == (B, L, L)
    assert bool(jnp.all(jnp.isfinite(out_d)))
    assert bool(jnp.all(jnp.isfinite(attn_d)))

    print("KERNEL_OK")
</pallas_src>

<mosaic_0001>
module attributes {stable_mosaic.version = 11 : i64} {
  func.func @_sdpa_kernel(%arg0: i32, %arg1: i32, %arg2: memref<4x8x16xf32, #tpu.memory_space<vmem>>, %arg3: memref<4x8x16xf32, #tpu.memory_space<vmem>>, %arg4: memref<4x8x16xf32, #tpu.memory_space<vmem>>, %arg5: memref<4x8x8xi8, #tpu.memory_space<vmem>>, %arg6: memref<4x8x16xf32, #tpu.memory_space<vmem>>, %arg7: memref<4x8x8xf32, #tpu.memory_space<vmem>>) attributes {dimension_semantics = [#tpu.dimension_semantics<parallel>, #tpu.dimension_semantics<parallel>], iteration_bounds = array<i64: 1, 1>, scalar_prefetch = 0 : i64, scratch_operands = 0 : i64, tpu.core_type = #tpu.core_type<tc>, window_params = [{transform_indices = @transform_0, window_bounds = array<i64: 4, 8, 16>}, {transform_indices = @transform_1, window_bounds = array<i64: 4, 8, 16>}, {transform_indices = @transform_2, window_bounds = array<i64: 4, 8, 16>}, {transform_indices = @transform_3, window_bounds = array<i64: 4, 8, 8>}, {transform_indices = @transform_4, window_bounds = array<i64: 4, 8, 16>}, {transform_indices = @transform_5, window_bounds = array<i64: 4, 8, 8>}]} {
    %c0 = arith.constant 0 : index
    %c0_0 = arith.constant 0 : index
    %c0_1 = arith.constant 0 : index
    %0 = vector.load %arg2[%c0, %c0_0, %c0_1] : memref<4x8x16xf32, #tpu.memory_space<vmem>>, vector<4x8x16xf32>
    %c0_2 = arith.constant 0 : index
    %c0_3 = arith.constant 0 : index
    %c0_4 = arith.constant 0 : index
    %1 = vector.load %arg3[%c0_2, %c0_3, %c0_4] : memref<4x8x16xf32, #tpu.memory_space<vmem>>, vector<4x8x16xf32>
    %c0_5 = arith.constant 0 : index
    %c0_6 = arith.constant 0 : index
    %c0_7 = arith.constant 0 : index
    %2 = vector.load %arg4[%c0_5, %c0_6, %c0_7] : memref<4x8x16xf32, #tpu.memory_space<vmem>>, vector<4x8x16xf32>
    %c0_8 = arith.constant 0 : index
    %c0_9 = arith.constant 0 : index
    %c0_10 = arith.constant 0 : index
    %3 = vector.load %arg5[%c0_8, %c0_9, %c0_10] : memref<4x8x8xi8, #tpu.memory_space<vmem>>, vector<4x8x8xi8>
    "tpu.trace_start"() <{level = 10 : i32, message = "bqd,bkd->bqk"}> : () -> ()
    %cst = arith.constant dense<0.000000e+00> : vector<4x8x8xf32>
    %4 = tpu.matmul %0, %1, %cst {dimension_numbers = #tpu.dot_dimension_numbers<[2], [2], [1], [1], [0, 0, 0, 1, 1, 1], [0], [0]>} : vector<4x8x16xf32>, vector<4x8x16xf32>, vector<4x8x8xf32> -> vector<4x8x8xf32>
    %c0_i8 = arith.constant 0 : i8
    "tpu.trace_stop"() : () -> ()
    %5 = vector.broadcast %c0_i8 : i8 to vector<4x8x8xi8>
    %6 = arith.cmpi ne, %3, %5 : vector<4x8x8xi8>
    %cst_11 = arith.constant 0xFF800000 : f32
    %7 = vector.broadcast %cst_11 : f32 to vector<4x8x8xf32>
    %8 = arith.select %6, %7, %4 : vector<4x8x8xi1>, vector<4x8x8xf32>
    %cst_12 = arith.constant dense<0xFF800000> : vector<4x8xf32>
    %9 = vector.multi_reduction <maximumf>, %8, %cst_12 [2] : vector<4x8x8xf32> to vector<4x8xf32>
    %10 = vector.shape_cast %9 : vector<4x8xf32> to vector<4x8x1xf32>
    %11 = vector.broadcast %10 : vector<4x8x1xf32> to vector<4x8x8xf32>
    %12 = arith.subf %8, %11 : vector<4x8x8xf32>
    %13 = math.exp %12 : vector<4x8x8xf32>
    %cst_13 = arith.constant dense<0.000000e+00> : vector<4x8xf32>
    %14 = vector.multi_reduction <add>, %13, %cst_13 [2] : vector<4x8x8xf32> to vector<4x8xf32>
    %15 = vector.shape_cast %14 : vector<4x8xf32> to vector<4x8x1xf32>
    %cst_14 = arith.constant 1.000000e+00 : f32
    %16 = vector.broadcast %cst_14 : f32 to vector<4x8x1xf32>
    %17 = arith.divf %16, %15 : vector<4x8x1xf32>
    %18 = vector.broadcast %17 : vector<4x8x1xf32> to vector<4x8x8xf32>
    %19 = arith.mulf %13, %18 : vector<4x8x8xf32>
    "tpu.trace_start"() <{level = 10 : i32, message = "bqk,bkd->bqd"}> : () -> ()
    %cst_15 = arith.constant dense<0.000000e+00> : vector<4x8x16xf32>
    %20 = tpu.matmul %19, %2, %cst_15 {dimension_numbers = #tpu.dot_dimension_numbers<[2], [1], [1], [2], [0, 0, 0, 1, 1, 2], [0], [0]>} : vector<4x8x8xf32>, vector<4x8x16xf32>, vector<4x8x16xf32> -> vector<4x8x16xf32>
    "tpu.trace_stop"() : () -> ()
    %c0_16 = arith.constant 0 : index
    %c0_17 = arith.constant 0 : index
    %c0_18 = arith.constant 0 : index
    %21 = vector.load %arg6[%c0_16, %c0_17, %c0_18] : memref<4x8x16xf32, #tpu.memory_space<vmem>>, vector<4x8x16xf32>
    tpu.vector_store %arg6[%c0_16, %c0_17, %c0_18], %20 {strides = array<i32>} : memref<4x8x16xf32, #tpu.memory_space<vmem>>, vector<4x8x16xf32>,
    %c0_19 = arith.constant 0 : index
    %c0_20 = arith.constant 0 : index
    %c0_21 = arith.constant 0 : index
    %22 = vector.load %arg7[%c0_19, %c0_20, %c0_21] : memref<4x8x8xf32, #tpu.memory_space<vmem>>, vector<4x8x8xf32>
    tpu.vector_store %arg7[%c0_19, %c0_20, %c0_21], %19 {strides = array<i32>} : memref<4x8x8xf32, #tpu.memory_space<vmem>>, vector<4x8x8xf32>,
    return
  }
  func.func @transform_0(%arg0: i32, %arg1: i32) -> (i32, i32, i32) {
    %c0_i32 = arith.constant 0 : i32
    %c0_i32_0 = arith.constant 0 : i32
    return %arg0, %arg1, %c0_i32 : i32, i32, i32
  }
  func.func @transform_1(%arg0: i32, %arg1: i32) -> (i32, i32, i32) {
    %c0_i32 = arith.constant 0 : i32
    %c0_i32_0 = arith.constant 0 : i32
    %c0_i32_1 = arith.constant 0 : i32
    return %arg0, %c0_i32, %c0_i32_0 : i32, i32, i32
  }
  func.func @transform_2(%arg0: i32, %arg1: i32) -> (i32, i32, i32) {
    %c0_i32 = arith.constant 0 : i32
    %c0_i32_0 = arith.constant 0 : i32
    %c0_i32_1 = arith.constant 0 : i32
    return %arg0, %c0_i32, %c0_i32_0 : i32, i32, i32
  }
  func.func @transform_3(%arg0: i32, %arg1: i32) -> (i32, i32, i32) {
    %c0_i32 = arith.constant 0 : i32
    %c0_i32_0 = arith.constant 0 : i32
    return %arg0, %arg1, %c0_i32 : i32, i32, i32
  }
  func.func @transform_4(%arg0: i32, %arg1: i32) -> (i32, i32, i32) {
    %c0_i32 = arith.constant 0 : i32
    %c0_i32_0 = arith.constant 0 : i32
    return %arg0, %arg1, %c0_i32 : i32, i32, i32
  }
  func.func @transform_5(%arg0: i32, %arg1: i32) -> (i32, i32, i32) {
    %c0_i32 = arith.constant 0 : i32
    %c0_i32_0 = arith.constant 0 : i32
    return %arg0, %arg1, %c0_i32 : i32, i32, i32
  }
}

</mosaic_0001>

<bundles_post_ra>
// kernel: tpu_custom_call.1
= control target key start
LH: loop header
LB: loop body
LE: loop exit
PB: predicated region body
PF: predicated region fallthrough
CT: control target
= control target key end

     0   :  { %11 = vsyncpa [#allocation3], 0  ;;  %s1186_s0 = inlined_call_operand.hbm [shape: f32[4,8,16], index: 0, kind: input, shape index: {}]   ;;  %s1187_s1 = inlined_call_operand.hbm [shape: f32[4,8,16], index: 1, kind: input, shape index: {}]   ;;  %s1188_s2 = inlined_call_operand.hbm [shape: f32[4,8,16], index: 2, kind: input, shape index: {}]   ;;  %s1189_s3 = inlined_call_operand.vmem [shape: s8[4,8,8], index: 3, kind: input, shape index: {}]   ;;  %s1190_s4 = inlined_call_operand.hbm [shape: f32[4,8,16], index: 4, kind: output, shape index: {0}]   ;;  %s1191_s5 = inlined_call_operand.hbm [shape: f32[4,8,8], index: 5, kind: output, shape index: {1}]  }
   0x1   :  { %12 = vsyncpa [#allocation6], 0 }
   0x2   :  { %13 = vsyncpa [#allocation4], 0 }
   0x3   :  { %14 = vsyncpa [#allocation10], 0  ;;  %s1000_s18 = smov [#allocation5]   ;;  %s1001_s20 = smov [#allocation2]  }
   0x4   :  { %s32_s19 = sshll.u32 %s1000_s18, 4  ;;  %s20_s21 = sshll.u32 %s1001_s20, 4  ;;  %s33_s19 = int_to_ptr.vmem [resolvable:$true] %s32_s19  ;;  %s1040_s21 = int_to_ptr.vmem [resolvable:$true] %s20_s21 }
   0x5   :  { %s882_s24 = scalar_lea.hbm %s1187_s1, 512 }
   0x6   :  { %p883_p0 = scmp.ne.s32.totalorder %s1187_s1, %s882_s24  ;;  %p886_p1 = scmp.lt.u32.totalorder %s882_s24, %s1187_s1 }
   0x8   :  { %p888_p2 = pnand %p886_p1, %p883_p0 }
   0xa   :  { %891 = shalt.err (!%p888_p2)
}
   0xb   :  { %s892_s29 = scalar_lea.vmem %s33_s19, 512  ;;  %p897_p4 = scmp.lt.s32.totalorder %s33_s19, %s33_s19 }
   0xc   :  { %p893_p3 = scmp.ne.s32.totalorder %s33_s19, %s892_s29  ;;  %p898_p5 = scmp.lt.s32.totalorder %s892_s29, %s892_s29 }
   0xe   :  { %p899_p6 = por %p898_p5, %p897_p4 }
  0x10   :  { %p900_p7 = pnand %p899_p6, %p893_p3 }
  0x12   :  { %903 = shalt.err (!%p900_p7)
}
  0x13   :  { %s1002_s30 = smov 128   ;;  %s1003_s6 = smov 8  }
  0x14   :  { %38 = dma.hbm_to_vmem [thread:$0]  %s1187_s1, 512, %s33_s19, [#allocation6], %s1002_s30, %s1002_s30, %s1003_s6  }
  0x15   :  { %s904_s11 = scalar_lea.hbm %s1186_s0, 512 }
  0x16   :  { %p905_p8 = scmp.ne.s32.totalorder %s1186_s0, %s904_s11  ;;  %p908_p9 = scmp.lt.u32.totalorder %s904_s11, %s1186_s0 }
  0x18   :  { %p910_p10 = pnand %p908_p9, %p905_p8 }
  0x1a   :  { %913 = shalt.err (!%p910_p10)
}
  0x1b   :  { %s914_s16 = scalar_lea.vmem %s1040_s21, 512  ;;  %p919_p12 = scmp.lt.s32.totalorder %s1040_s21, %s1040_s21 }
  0x1c   :  { %p915_p11 = scmp.ne.s32.totalorder %s1040_s21, %s914_s16  ;;  %p920_p13 = scmp.lt.s32.totalorder %s914_s16, %s914_s16 }
  0x1e   :  { %p921_p0 = por %p920_p13, %p919_p12 }
  0x20   :  { %p922_p1 = pnand %p921_p0, %p915_p11 }
  0x22   :  { %925 = shalt.err (!%p922_p1)
}
  0x23   :  { %26 = dma.hbm_to_vmem [thread:$0]  %s1186_s0, 512, %s1040_s21, [#allocation3], %s1002_s30, %s1002_s30, %s1003_s6  }
  0x24   :  { %s1004_s18 = smov [#allocation7]   ;;  %s926_s23 = scalar_lea.hbm %s1188_s2, 512 }
  0x25   :  { %s44_s19 = sshll.u32 %s1004_s18, 4  ;;  %p927_p2 = scmp.ne.s32.totalorder %s1188_s2, %s926_s23  ;;  %s45_s19 = int_to_ptr.vmem [resolvable:$true] %s44_s19 }
  0x26   :  { %p930_p3 = scmp.lt.u32.totalorder %s926_s23, %s1188_s2 }
  0x28   :  { %p932_p4 = pnand %p930_p3, %p927_p2 }
  0x2a   :  { %935 = shalt.err (!%p932_p4)
}
  0x2b   :  { %s936_s28 = scalar_lea.vmem %s45_s19, 512  ;;  %p941_p6 = scmp.lt.s32.totalorder %s45_s19, %s45_s19 }
  0x2c   :  { %p937_p5 = scmp.ne.s32.totalorder %s45_s19, %s936_s28  ;;  %p942_p7 = scmp.lt.s32.totalorder %s936_s28, %s936_s28 }
  0x2e   :  { %p943_p8 = por %p942_p7, %p941_p6 }
  0x30   :  { %p944_p9 = pnand %p943_p8, %p937_p5 }
  0x32   :  { %947 = shalt.err (!%p944_p9)
}
  0x33   :  { %50 = dma.hbm_to_vmem [thread:$0]  %s1188_s2, 512, %s45_s19, [#allocation6], %s1002_s30, %s1002_s30, %s1003_s6  }
  0x34   :  { %992 = dma.done.wait [#allocation3], 512  }
  0x35   :  { %993 = vsyncadd [#allocation3], 4294966784 }
  0x36   :  { %994 = dma.done.wait [#allocation6], 1024  }
  0x37   :  { %995 = vsyncadd [#allocation6], 4294966272  ;;  %v1005_v0 = vmov 0.0   ;;  %vm1006_vm0 = vmmov 0   ;;  %vm80_vm1 = vcmask 130048   ;;  %v68_v1 = vld [vmem:[#allocation5] sm:$0xff] }
  0x38   :  { %816 = vmatprep.subr.mxu0 %v1005_v0  ;;  %818 = vmatprep.mubr.msk.f32.mxu0 %vm1006_vm0, %v1005_v0  ;;  %v69_v2 = vld [vmem:[#allocation5 + $0x8] sm:$0xff]  ;;  %v64_v3 = vld [vmem:[#allocation2] sm:$0xff]  ;;  %v70_v5 = vld [vmem:[#allocation5 + $0x10] sm:$0xff]  ;;  %v1007_v13 = vmov 0   ;;  %vm405_vm8 = vcmask 64512  }
  0x39   :  { %821 = vmatprep.subr.mxu1 %v1005_v0  ;;  %823 = vmatprep.mubr.msk.f32.mxu1 %vm1006_vm0, %v1005_v0  ;;  %v65_v4 = vld [vmem:[#allocation2 + $0x8] sm:$0xff]  ;;  %v71_v6 = vld [vmem:[#allocation5 + $0x18] sm:$0xff]  ;;  %v66_v7 = vld [vmem:[#allocation2 + $0x10] sm:$0xff] }
  0x3a   :  { %817 = vmatpush3.xpose.msk.msra.mxu0 %vm80_vm1, %v68_v1  ;;  %822 = vmatpush3.xpose.msk.msra.mxu1 %vm80_vm1, %v69_v2  ;;  %v67_v8 = vld [vmem:[#allocation2 + $0x18] sm:$0xff]  ;;  %v76_v9 = vld [vmem:[%s1189_s3] sm:$0x3]  ;;  %v77_v10 = vld [vmem:[%s1189_s3 + $0x2] sm:$0x3] }
  0x3b   :  { %826 = vmatprep.subr.mxu0 %v1005_v0  ;;  %831 = vmatprep.subr.mxu1 %v1005_v0  ;;  %vm385_vm2 = vnez %v76_v9  ;;  %vm386_vm3 = vnez %v77_v10  ;;  %v78_v11 = vld [vmem:[%s1189_s3 + $0x4] sm:$0x3]  ;;  %v79_v12 = vld [vmem:[%s1189_s3 + $0x6] sm:$0x3]  ;;  %v73_v59 = vld [vmem:[#allocation7 + $0x8] sm:$0xff]  ;;  %s1008_s3 = smov [#allocation9]  }
  0x3c   :  { %v389_v14 = vsel %vm385_vm2, 16843009, %v1007_v13  ;;  %v390_v15 = vsel %vm386_vm3, 16843009, %v1007_v13  ;;  %vm387_vm4 = vnez %v78_v11  ;;  %vm388_vm5 = vnez %v79_v12  ;;  %v72_v58 = vld [vmem:[#allocation7] sm:$0xff]  ;;  %s771_s13 = sshll.u32 %s1008_s3, 4  ;;  %s772_s13 = int_to_ptr.vmem [resolvable:$true] %s771_s13 }
  0x3d   :  { %819 = vmatmul.mubr.msk.f32.vlgmr.msra.gmra.mrb[0].mxu0 %vm80_vm1, %v64_v3  ;;  %824 = vmatmul.mubr.msk.f32.vlgmr.msra.gmra.mrb[0].mxu1 %vm80_vm1, %v65_v4  ;;  %v393_v16 = vunpack.c.0.s8 %v389_v14  ;;  %v394_v17 = vunpack.c.0.s8 %v390_v15  ;;  %v391_v18 = vsel %vm387_vm4, 16843009, %v1007_v13  ;;  %v392_v19 = vsel %vm388_vm5, 16843009, %v1007_v13  ;;  %v74_v3 = vld [vmem:[#allocation7 + $0x10] sm:$0xff]  ;;  %s948_s14 = scalar_lea.vmem %s772_s13, 512  ;;  %p953_p11 = scmp.lt.s32.totalorder %s772_s13, %s772_s13 }
  0x3e   :  { %827 = vmatpush3.xpose.msk.msra.mxu0 %vm80_vm1, %v70_v5  ;;  %828 = vmatprep.mubr.msk.f32.mxu0 %vm1006_vm0, %v1005_v0  ;;  %v395_v20 = vunpack.c.0.s8 %v391_v18  ;;  %v396_v21 = vunpack.c.0.s8 %v392_v19  ;;  %p949_p10 = scmp.ne.s32.totalorder %s772_s13, %s948_s14  ;;  %p954_p12 = scmp.lt.s32.totalorder %s948_s14, %s948_s14 }
  0x3f   :  { %832 = vmatpush3.xpose.msk.msra.mxu1 %vm80_vm1, %v71_v6  ;;  %833 = vmatprep.mubr.msk.f32.mxu1 %vm1006_vm0, %v1005_v0  ;;  %vm397_vm6 = vcmp.ne.s32.totalorder %v393_v16, 0  ;;  %vm398_vm7 = vcmp.ne.s32.totalorder %v394_v17, 0 }
  0x40   :  { %836 = vmatprep.subr.mxu0 %v1005_v0  ;;  %841 = vmatprep.subr.mxu1 %v1005_v0  ;;  %vm399_vm9 = vcmp.ne.s32.totalorder %v395_v20, 0  ;;  %vm400_vm10 = vcmp.ne.s32.totalorder %v396_v21, 0  ;;  %p955_p13 = por %p954_p12, %p953_p11 }
  0x41   :  { %829 = vmatmul.mubr.msk.f32.vlgmr.msra.gmra.mrb[2].mxu0 %vm80_vm1, %v66_v7  ;;  %v75_v7 = vld [vmem:[#allocation7 + $0x18] sm:$0xff] }
  0x42   :  { %834 = vmatmul.mubr.msk.f32.vlgmr.msra.gmra.mrb[2].mxu1 %vm80_vm1, %v67_v8  ;;  %838 = vmatprep.mubr.msk.f32.mxu0 %vm1006_vm0, %v1005_v0  ;;  %p956_p0 = pnand %p955_p13, %p949_p10 }
  0x43   :  { %843 = vmatprep.mubr.msk.f32.mxu1 %vm1006_vm0, %v1005_v0  ;;  %837 = vmatpush3.msra.mxu0 %v72_v58 }
  0x44   :  { %846 = vmatprep.subr.mxu0 %v1005_v0  ;;  %842 = vmatpush3.msra.mxu1 %v73_v59 }
  0x45   :  { %851 = vmatprep.subr.mxu1 %v1005_v0 }
 0x110   :  { %v153_v22 = vpop.f32.mrb[0].mxu0  ;;  %v229_v23 = vpop.f32.mrb[0].mxu1 }
 0x111   :  { %v401_v24 = vsel %vm397_vm6, -inf, %v153_v22  ;;  %v820_v25 = vpop.f32.mrb[1].mxu0  ;;  %v402_v26 = vsel %vm398_vm7, -inf, %v229_v23  ;;  %v825_v27 = vpop.f32.mrb[1].mxu1 }
 0x112   :  { %v406_v28 = vsel %vm405_vm8, %v401_v24, -inf  ;;  %v409_v30 = vsel %vm405_vm8, %v402_v26, -inf }
 0x113   :  { %407 = vmax.xlane.f32.xlu0 %v406_v28 }
 0x114   :  { %v305_v29 = vpop.f32.mrb[2].mxu0 }
 0x115   :  { %v403_v31 = vsel %vm399_vm9, -inf, %v305_v29  ;;  %v830_v32 = vpop.f32.mrb[3].mxu0  ;;  %v381_v33 = vpop.f32.mrb[2].mxu1 }
 0x116   :  { %v412_v34 = vsel %vm405_vm8, %v403_v31, -inf  ;;  %v404_v35 = vsel %vm400_vm10, -inf, %v381_v33  ;;  %v835_v36 = vpop.f32.mrb[3].mxu1 }
 0x117   :  { %410 = vmax.xlane.f32.xlu0 %v409_v30  ;;  %413 = vmax.xlane.f32.xlu1 %v412_v34  ;;  %v415_v37 = vsel %vm405_vm8, %v404_v35, -inf }
 0x11b   :  { %416 = vmax.xlane.f32.xlu1 %v415_v37 }
 0x1a0   :  { %v408_v38 = vpop.xlane.xlu0 %407 }
 0x1a1   :  { %v418_v39 = vsub.f32 %v401_v24, %v408_v38 }
 0x1a3   :  { %v422_v40 = vmul.f32 1.442695, %v418_v39 }
 0x1a4   :  { %v411_v41 = vpop.xlane.xlu0 %410  ;;  %v414_v42 = vpop.xlane.xlu1 %413 }
 0x1a5   :  { %866 = vpow2.f32 %v422_v40  ;;  %v419_v43 = vsub.f32 %v402_v26, %v411_v41  ;;  %v420_v44 = vsub.f32 %v403_v31, %v414_v42 }
 0x1a7   :  { %v424_v45 = vmul.f32 1.442695, %v419_v43  ;;  %v426_v46 = vmul.f32 1.442695, %v420_v44 }
 0x1a8   :  { %v417_v47 = vpop.xlane.xlu1 %416 }
 0x1a9   :  { %868 = vpow2.f32 %v424_v45  ;;  %v421_v48 = vsub.f32 %v404_v35, %v417_v47 }
 0x1aa   :  { %870 = vpow2.f32 %v426_v46 }
 0x1ab   :  { %v428_v49 = vmul.f32 1.442695, %v421_v48 }
 0x1ad   :  { %872 = vpow2.f32 %v428_v49 }
 0x1af   :  { %v867_v50 = vpop.eup %866 }
 0x1b0   :  { %v430_v51 = vsel %vm405_vm8, %v867_v50, 0.0 }
 0x1b1   :  { %431 = vadd.xlane.f32.xlu0 %v430_v51 }
 0x1b3   :  { %v869_v52 = vpop.eup %868 }
 0x1b4   :  { %v871_v53 = vpop.eup %870  ;;  %v433_v54 = vsel %vm405_vm8, %v869_v52, 0.0 }
 0x1b5   :  { %434 = vadd.xlane.f32.xlu1 %v433_v54  ;;  %v436_v55 = vsel %vm405_vm8, %v871_v53, 0.0 }
 0x1b6   :  { %437 = vadd.xlane.f32.xlu0 %v436_v55 }
 0x1b7   :  { %v873_v56 = vpop.eup %872 }
 0x1b8   :  { %v439_v57 = vsel %vm405_vm8, %v873_v56, 0.0 }
 0x1b9   :  { %440 = vadd.xlane.f32.xlu1 %v439_v57 }
 0x23e   :  { %v432_v60 = vpop.xlane.xlu0 %431 }
 0x23f   :  { %874 = vrcp.f32 %v432_v60 }
 0x242   :  { %v435_v61 = vpop.xlane.xlu1 %434 }
 0x243   :  { %v438_v62 = vpop.xlane.xlu0 %437  ;;  %876 = vrcp.f32 %v435_v61 }
 0x244   :  { %878 = vrcp.f32 %v438_v62 }
 0x246   :  { %v441_v63 = vpop.xlane.xlu1 %440 }
 0x247   :  { %880 = vrcp.f32 %v441_v63 }
 0x249   :  { %v875_v1 = vpop.eup %874 }
 0x24a   :  { %v450_v2 = vmul.f32 %v875_v1, %v867_v50 }
 0x24c   :  { %750 = vst.msk [vmem:[#allocation9] sm:$0xff] %vm405_vm8, %v450_v2  ;;  %839 = vmatmul.mubr.msk.f32.vlgmr.msra.gmra.mrb[4].mxu0 %vm405_vm8, %v450_v2 }
 0x24d   :  { %v877_v4 = vpop.eup %876  ;;  %847 = vmatpush3.msra.mxu0 %v74_v3  ;;  %848 = vmatprep.mubr.msk.f32.mxu0 %vm1006_vm0, %v1005_v0 }
 0x24e   :  { %v879_v5 = vpop.eup %878  ;;  %v451_v6 = vmul.f32 %v877_v4, %v869_v52 }
 0x24f   :  { %v452_v8 = vmul.f32 %v879_v5, %v871_v53 }
 0x250   :  { %751 = vst.msk [vmem:[#allocation9 + $0x8] sm:$0xff] %vm405_vm8, %v451_v6  ;;  %844 = vmatmul.mubr.msk.f32.vlgmr.msra.gmra.mrb[4].mxu1 %vm405_vm8, %v451_v6 }
 0x251   :  { %v881_v9 = vpop.eup %880  ;;  %752 = vst.msk [vmem:[#allocation9 + $0x10] sm:$0xff] %vm405_vm8, %v452_v8  ;;  %849 = vmatmul.mubr.msk.f32.vlgmr.msra.gmra.mrb[6].mxu0 %vm405_vm8, %v452_v8  ;;  %852 = vmatpush3.msra.mxu1 %v75_v7 }
 0x252   :  { %v453_v10 = vmul.f32 %v881_v9, %v873_v56  ;;  %853 = vmatprep.mubr.msk.f32.mxu1 %vm1006_vm0, %v1005_v0 }
 0x254   :  { %753 = vst.msk [vmem:[#allocation9 + $0x18] sm:$0xff] %vm405_vm8, %v453_v10  ;;  %854 = vmatmul.mubr.msk.f32.vlgmr.msra.gmra.mrb[6].mxu1 %vm405_vm8, %v453_v10 }
 0x255   :  { %959 = shalt.err (!%p956_p0)
}
 0x256   :  { %s960_s1 = scalar_lea.hbm %s1191_s5, 512 }
 0x257   :  { %p961_p1 = scmp.ne.s32.totalorder %s1191_s5, %s960_s1  ;;  %p964_p2 = scmp.lt.u32.totalorder %s960_s1, %s1191_s5 }
 0x259   :  { %p966_p3 = pnand %p964_p2, %p961_p1 }
 0x25b   :  { %969 = shalt.err (!%p966_p3)
}
 0x25c   :  { %777 = dma.vmem_to_hbm [thread:$0]  %s772_s13, 512, %s1191_s5, [#allocation10], %s1002_s30, %s1002_s30, %s1003_s6  }
 0x25d   :  { %s1009_s24 = smov [#allocation8]  }
 0x25e   :  { %s759_s25 = sshll.u32 %s1009_s24, 4  ;;  %s760_s25 = int_to_ptr.vmem [resolvable:$true] %s759_s25 }
 0x25f   :  { %s970_s5 = scalar_lea.vmem %s760_s25, 512  ;;  %p975_p5 = scmp.lt.s32.totalorder %s760_s25, %s760_s25 }
 0x260   :  { %p971_p4 = scmp.ne.s32.totalorder %s760_s25, %s970_s5  ;;  %p976_p6 = scmp.lt.s32.totalorder %s970_s5, %s970_s5 }
 0x262   :  { %p977_p7 = por %p976_p6, %p975_p5 }
 0x264   :  { %p978_p8 = pnand %p977_p7, %p971_p4 }
 0x31f   :  { %v523_v0 = vpop.f32.mrb[4].mxu0 }
 0x320   :  { %746 = vst.msk [vmem:[#allocation8] sm:$0xff] %vm80_vm1, %v523_v0  ;;  %v840_v11 = vpop.f32.mrb[5].mxu0 }
 0x323   :  { %v596_v12 = vpop.f32.mrb[4].mxu1 }
 0x324   :  { %747 = vst.msk [vmem:[#allocation8 + $0x8] sm:$0xff] %vm80_vm1, %v596_v12  ;;  %v669_v13 = vpop.f32.mrb[6].mxu0  ;;  %v845_v14 = vpop.f32.mrb[5].mxu1 }
 0x325   :  { %748 = vst.msk [vmem:[#allocation8 + $0x10] sm:$0xff] %vm80_vm1, %v669_v13  ;;  %v850_v15 = vpop.f32.mrb[7].mxu0 }
 0x327   :  { %v742_v16 = vpop.f32.mrb[6].mxu1 }
 0x328   :  { %749 = vst.msk [vmem:[#allocation8 + $0x18] sm:$0xff] %vm80_vm1, %v742_v16  ;;  %v855_v17 = vpop.f32.mrb[7].mxu1 }
 0x329   :  { %981 = shalt.err (!%p978_p8)
}
 0x32a   :  { %s982_s28 = scalar_lea.hbm %s1190_s4, 512 }
 0x32b   :  { %p983_p9 = scmp.ne.s32.totalorder %s1190_s4, %s982_s28  ;;  %p986_p10 = scmp.lt.u32.totalorder %s982_s28, %s1190_s4 }
 0x32d   :  { %p988_p11 = pnand %p986_p10, %p983_p9 }
 0x32f   :  { %991 = shalt.err (!%p988_p11)
}
 0x330   :  { %765 = dma.vmem_to_hbm [thread:$0]  %s760_s25, 512, %s1190_s4, [#allocation4], %s1002_s30, %s1002_s30, %s1003_s6  }
 0x331   :  { %996 = dma.done.wait [#allocation4], 512  }
 0x332   :  { %997 = vsyncadd [#allocation4], 4294966784 }
 0x333   :  { %998 = dma.done.wait [#allocation10], 512  }
 0x334   :  { %999 = vsyncadd [#allocation10], 4294966784 }
 0x335   :  { %784 = vsyncpa [#allocation3], 1 }
 0x336   :  { %785 = vsyncpa [#allocation6], 1 }
 0x337   :  { %786 = vsyncpa [#allocation4], 1 }
 0x338   :  { %787 = vsyncpa [#allocation10], 1 }

</bundles_post_ra>
